<compile_context>
chip_gen: v6e
topology: v6e:2x2x1
jax: 0.10.0
libtpu: 0.0.40
codegen_flags: <defaults>
</compile_context>

<pallas_src>
import functools

import jax
import jax.numpy as jnp
import numpy as np
from jax.experimental import pallas as pl
from jax.experimental.pallas import tpu as pltpu


def _msb_kernel(x_ref, w1_ref, b1_ref, w2_ref, b2_ref, mw_ref, mb_ref, sel_ref,
                out_ref, *, fusion_types):
    x = x_ref[0]                                            # (C, L) f32, lanes = spatial

    # ---- input_conv with BN folded: y = W2 @ relu(W1' @ x + b1') + b2 ----
    h = jnp.dot(w1_ref[...], x, preferred_element_type=jnp.float32) + b1_ref[...]
    h = jnp.maximum(h, 0.0)                                 # (planes, L)
    y = jnp.dot(w2_ref[...], h, preferred_element_type=jnp.float32) + b2_ref[...]  # (C, L)

    # ---- grouped 1x1-conv mask: one block-diagonal matmul for all heads here ----
    m = jnp.dot(y, mw_ref[0], preferred_element_type=jnp.float32) + mb_ref[0]      # (C, hpb)
    # softmax over the channel axis (PyTorch: softmax(dim=2))
    m = m - jnp.max(m, axis=0, keepdims=True)
    e = jnp.exp(m)
    p = e * pl.reciprocal(jnp.sum(e, axis=0, keepdims=True))                        # (C, hpb)

    # broadcast each head's probabilities over its G spatial positions, then
    # reduce over channels -> one context scalar per spatial position
    p_full = jnp.dot(p, sel_ref[0], preferred_element_type=jnp.float32)             # (C, L)
    ctx = jnp.sum(y * p_full, axis=0, keepdims=True)                                # (1, L)

    out = x
    if 'channel_mul' in fusion_types:
        out = out * jax.nn.sigmoid(ctx)
    if 'channel_add' in fusion_types:
        out = out + ctx
    out_ref[0] = out


def _heads_per_block(G, head_num):
    """Smallest number of heads per grid step whose lane width is 128-aligned."""
    for cand in range(1, head_num + 1):
        if head_num % cand == 0 and (cand * G) % 128 == 0:
            return cand
    return head_num   # fall back: all heads in one block (lane width == HW)


def multihead_spatial_block(x_nchw, params, *, head_num=4,
                            fusion_types=('channel_add',)):
    B, C, H, W = x_nchw.shape
    HW = H * W
    assert HW % head_num == 0
    G = HW // head_num
    dt = jnp.float32

    # NCHW -> (B, C, HW): a *free* reshape (no transpose, no extra HBM traffic).
    x = x_nchw.reshape(B, C, HW).astype(dt)

    planes = params['w1'].shape[0]

    # Fold the eval-mode BatchNorm affine into the first 1x1 conv.
    s = params['bn_scale'].astype(dt)
    t = params['bn_shift'].astype(dt)
    w1f = params['w1'].astype(dt) * s[:, None]                     # (planes, C)
    b1f = (params['b1'].astype(dt) * s + t).reshape(planes, 1)     # (planes, 1)
    w2m = params['w2'].astype(dt)                                  # (C, planes)
    b2m = params['b2'].astype(dt).reshape(C, 1)                    # (C, 1)

    # Heads partition HW contiguously, so split them across the grid.
    hpb = _heads_per_block(G, head_num)        # heads per grid step
    n_hblk = head_num // hpb
    L = hpb * G                                # lane width per block

    # Block-diagonal grouped-conv weights, per head-block: (n_hblk, L, hpb)
    mask_w_r = params['mask_w'].astype(dt).reshape(n_hblk, hpb, G)
    eye_h = jnp.eye(hpb, dtype=dt)
    mw_blk = (mask_w_r[:, :, :, None] * eye_h[None, :, None, :]).reshape(n_hblk, L, hpb)
    # Selector that broadcasts each head's softmax column over its G positions.
    sel_blk = jnp.tile(jnp.repeat(eye_h, G, axis=1)[None], (n_hblk, 1, 1))  # (n_hblk, hpb, L)
    mb_blk = params['mask_b'].astype(dt).reshape(n_hblk, 1, hpb)

    kernel = functools.partial(_msb_kernel, fusion_types=tuple(fusion_types))

    cost = pl.CostEstimate(
        flops=2 * B * HW * C * (2 * planes + 2 * hpb + 1),
        transcendentals=B * head_num * (C + 1),
        bytes_accessed=4 * (2 * B * C * HW + w1f.size + b1f.size + w2m.size
                            + b2m.size + mw_blk.size + sel_blk.size + mb_blk.size),
    )

    full2d = lambda b, j: (0, 0)

    out = pl.pallas_call(
        kernel,
        out_shape=jax.ShapeDtypeStruct((B, C, HW), dt),
        grid_spec=pltpu.PrefetchScalarGridSpec(
            num_scalar_prefetch=0,
            grid=(B, n_hblk),
            in_specs=[
                pl.BlockSpec((1, C, L), lambda b, j: (b, 0, j)),     # x
                pl.BlockSpec((planes, C), full2d),                   # w1 (BN folded)
                pl.BlockSpec((planes, 1), full2d),                   # b1 (BN folded)
                pl.BlockSpec((C, planes), full2d),                   # w2
                pl.BlockSpec((C, 1), full2d),                        # b2
                pl.BlockSpec((1, L, hpb), lambda b, j: (j, 0, 0)),   # block-diag mask weights
                pl.BlockSpec((1, 1, hpb), lambda b, j: (j, 0, 0)),   # mask bias
                pl.BlockSpec((1, hpb, L), lambda b, j: (j, 0, 0)),   # head selector
            ],
            out_specs=pl.BlockSpec((1, C, L), lambda b, j: (b, 0, j)),
        ),
        compiler_params=pltpu.CompilerParams(
            dimension_semantics=("parallel", "parallel")),
        cost_estimate=cost,
    )(x, w1f, b1f, w2m, b2m, mw_blk, mb_blk, sel_blk)

    # (B, C, HW) -> NCHW: again a free reshape.
    return out.reshape(B, C, H, W)


def init_params(key, inplanes, ratio, head_num, H, W):
    """Parameters in PyTorch orientation (conv weight = (out, in))."""
    planes = int(inplanes * ratio)
    HW = H * W
    G = HW // head_num
    ks = jax.random.split(key, 9)
    eps = 1e-5
    w1 = jax.random.normal(ks[0], (planes, inplanes), jnp.float32) * (1.0 / np.sqrt(inplanes))
    b1 = 0.1 * jax.random.normal(ks[1], (planes,), jnp.float32)
    gamma = 1.0 + 0.1 * jax.random.normal(ks[2], (planes,), jnp.float32)
    beta = 0.1 * jax.random.normal(ks[3], (planes,), jnp.float32)
    run_mean = 0.1 * jax.random.normal(ks[4], (planes,), jnp.float32)
    run_var = jnp.abs(1.0 + 0.1 * jax.random.normal(ks[5], (planes,), jnp.float32))
    inv_std = 1.0 / jnp.sqrt(run_var + eps)
    bn_scale = gamma * inv_std
    bn_shift = beta - run_mean * gamma * inv_std
    w2 = jax.random.normal(ks[6], (inplanes, planes), jnp.float32) * (1.0 / np.sqrt(planes))
    b2 = 0.1 * jax.random.normal(ks[7], (inplanes,), jnp.float32)
    km = jax.random.split(ks[8], 2)
    mask_w = jax.random.normal(km[0], (head_num, G), jnp.float32) * (1.0 / np.sqrt(G))
    mask_b = 0.1 * jax.random.normal(km[1], (head_num,), jnp.float32)
    return dict(w1=w1, b1=b1, bn_scale=bn_scale, bn_shift=bn_shift,
                w2=w2, b2=b2, mask_w=mask_w, mask_b=mask_b)


def reference(x_nchw, params, head_num, fusion_types):
    """Pure-JAX reference matching the PyTorch forward pass."""
    B, C, H, W = x_nchw.shape
    HW = H * W
    G = HW // head_num
    x = x_nchw.astype(jnp.float32)
    h = jnp.einsum('pc,bchw->bphw', params['w1'], x) + params['b1'][None, :, None, None]
    h = h * params['bn_scale'][None, :, None, None] + params['bn_shift'][None, :, None, None]
    h = jnp.maximum(h, 0.0)
    y = jnp.einsum('cp,bphw->bchw', params['w2'], h) + params['b2'][None, :, None, None]
    yt = jnp.transpose(y, (0, 2, 3, 1)).reshape(B, head_num, G, C)
    m = jnp.einsum('hg,bhgc->bhc', params['mask_w'], yt) + params['mask_b'][None, :, None]
    p = jax.nn.softmax(m, axis=-1)
    ctx = jnp.einsum('bhgc,bhc->bhg', yt, p).reshape(B, 1, H, W)
    out = x
    if 'channel_mul' in fusion_types:
        out = out * jax.nn.sigmoid(ctx)
    if 'channel_add' in fusion_types:
        out = out + ctx
    return out


if __name__ == "__main__":
    B, inplanes, H, W = 2, 8, 16, 16
    ratio, head_num = 0.5, 4
    fusion_types = ('channel_add',)

    key = jax.random.PRNGKey(0)
    kx, kp = jax.random.split(key)
    x = jax.random.normal(kx, (B, inplanes, H, W), jnp.float32)
    params = init_params(kp, inplanes, ratio, head_num, H, W)

    out = multihead_spatial_block(x, params, head_num=head_num,
                                  fusion_types=fusion_types)
    out = jax.block_until_ready(out)

    ref = reference(x, params, head_num, fusion_types)
    np.testing.assert_allclose(np.asarray(out), np.asarray(ref),
                               rtol=1e-3, atol=1e-3)
    print("KERNEL_OK")
</pallas_src>

<mosaic_0001>
module attributes {stable_mosaic.version = 11 : i64} {
  func.func @_msb_kernel(%arg0: i32, %arg1: i32, %arg2: memref<1x8x128xf32, #tpu.memory_space<vmem>>, %arg3: memref<4x8xf32, #tpu.memory_space<vmem>>, %arg4: memref<4x1xf32, #tpu.memory_space<vmem>>, %arg5: memref<8x4xf32, #tpu.memory_space<vmem>>, %arg6: memref<8x1xf32, #tpu.memory_space<vmem>>, %arg7: memref<1x128x2xf32, #tpu.memory_space<vmem>>, %arg8: memref<1x1x2xf32, #tpu.memory_space<vmem>>, %arg9: memref<1x2x128xf32, #tpu.memory_space<vmem>>, %arg10: memref<1x8x128xf32, #tpu.memory_space<vmem>>) attributes {dimension_semantics = [#tpu.dimension_semantics<parallel>, #tpu.dimension_semantics<parallel>], iteration_bounds = array<i64: 2, 2>, scalar_prefetch = 0 : i64, scratch_operands = 0 : i64, tpu.core_type = #tpu.core_type<tc>, window_params = [{transform_indices = @transform_0, window_bounds = array<i64: 1, 8, 128>}, {pipeline_mode = #tpu.pipeline_mode<synchronous>, transform_indices = @transform_1, window_bounds = array<i64: 4, 8>}, {pipeline_mode = #tpu.pipeline_mode<synchronous>, transform_indices = @transform_2, window_bounds = array<i64: 4, 1>}, {pipeline_mode = #tpu.pipeline_mode<synchronous>, transform_indices = @transform_3, window_bounds = array<i64: 8, 4>}, {pipeline_mode = #tpu.pipeline_mode<synchronous>, transform_indices = @transform_4, window_bounds = array<i64: 8, 1>}, {transform_indices = @transform_5, window_bounds = array<i64: 1, 128, 2>}, {transform_indices = @transform_6, window_bounds = array<i64: 1, 1, 2>}, {transform_indices = @transform_7, window_bounds = array<i64: 1, 2, 128>}, {transform_indices = @transform_8, window_bounds = array<i64: 1, 8, 128>}]} {
    %c0 = arith.constant 0 : index
    %c0_0 = arith.constant 0 : index
    %c0_1 = arith.constant 0 : index
    %0 = vector.load %arg2[%c0, %c0_0, %c0_1] : memref<1x8x128xf32, #tpu.memory_space<vmem>>, vector<1x8x128xf32>
    %1 = vector.shape_cast %0 : vector<1x8x128xf32> to vector<8x128xf32>
    %c0_2 = arith.constant 0 : index
    %c0_3 = arith.constant 0 : index
    %2 = vector.load %arg3[%c0_2, %c0_3] : memref<4x8xf32, #tpu.memory_space<vmem>>, vector<4x8xf32>
    %cst = arith.constant dense<0.000000e+00> : vector<4x128xf32>
    %3 = tpu.matmul %2, %1, %cst {dimension_numbers = #tpu.dot_dimension_numbers<[1], [0], [0], [1], [0, 0, 1, 1], [], []>} : vector<4x8xf32>, vector<8x128xf32>, vector<4x128xf32> -> vector<4x128xf32>
    %c0_4 = arith.constant 0 : index
    %c0_5 = arith.constant 0 : index
    %4 = vector.load %arg4[%c0_4, %c0_5] : memref<4x1xf32, #tpu.memory_space<vmem>>, vector<4x1xf32>
    %5 = vector.broadcast %4 : vector<4x1xf32> to vector<4x128xf32>
    %6 = arith.addf %3, %5 : vector<4x128xf32>
    %cst_6 = arith.constant 0.000000e+00 : f32
    %7 = vector.broadcast %cst_6 : f32 to vector<4x128xf32>
    %8 = arith.maximumf %6, %7 : vector<4x128xf32>
    %c0_7 = arith.constant 0 : index
    %c0_8 = arith.constant 0 : index
    %9 = vector.load %arg5[%c0_7, %c0_8] : memref<8x4xf32, #tpu.memory_space<vmem>>, vector<8x4xf32>
    %cst_9 = arith.constant dense<0.000000e+00> : vector<8x128xf32>
    %10 = tpu.matmul %9, %8, %cst_9 {dimension_numbers = #tpu.dot_dimension_numbers<[1], [0], [0], [1], [0, 0, 1, 1], [], []>} : vector<8x4xf32>, vector<4x128xf32>, vector<8x128xf32> -> vector<8x128xf32>
    %c0_10 = arith.constant 0 : index
    %c0_11 = arith.constant 0 : index
    %11 = vector.load %arg6[%c0_10, %c0_11] : memref<8x1xf32, #tpu.memory_space<vmem>>, vector<8x1xf32>
    %12 = vector.broadcast %11 : vector<8x1xf32> to vector<8x128xf32>
    %13 = arith.addf %10, %12 : vector<8x128xf32>
    %c0_12 = arith.constant 0 : index
    %c0_13 = arith.constant 0 : index
    %c0_14 = arith.constant 0 : index
    %14 = vector.load %arg7[%c0_12, %c0_13, %c0_14] : memref<1x128x2xf32, #tpu.memory_space<vmem>>, vector<1x128x2xf32>
    %15 = vector.shape_cast %14 : vector<1x128x2xf32> to vector<128x2xf32>
    %cst_15 = arith.constant dense<0.000000e+00> : vector<8x2xf32>
    %16 = tpu.matmul %13, %15, %cst_15 {dimension_numbers = #tpu.dot_dimension_numbers<[1], [0], [0], [1], [0, 0, 1, 1], [], []>} : vector<8x128xf32>, vector<128x2xf32>, vector<8x2xf32> -> vector<8x2xf32>
    %c0_16 = arith.constant 0 : index
    %c0_17 = arith.constant 0 : index
    %c0_18 = arith.constant 0 : index
    %17 = vector.load %arg8[%c0_16, %c0_17, %c0_18] : memref<1x1x2xf32, #tpu.memory_space<vmem>>, vector<1x1x2xf32>
    %18 = vector.shape_cast %17 : vector<1x1x2xf32> to vector<1x2xf32>
    %19 = vector.broadcast %18 : vector<1x2xf32> to vector<8x2xf32>
    %20 = arith.addf %16, %19 : vector<8x2xf32>
    %cst_19 = arith.constant dense<0xFF800000> : vector<2xf32>
    %21 = vector.multi_reduction <maximumf>, %20, %cst_19 [0] : vector<8x2xf32> to vector<2xf32>
    %22 = vector.shape_cast %21 : vector<2xf32> to vector<1x2xf32>
    %23 = vector.broadcast %22 : vector<1x2xf32> to vector<8x2xf32>
    %24 = arith.subf %20, %23 : vector<8x2xf32>
    %25 = math.exp %24 : vector<8x2xf32>
    %cst_20 = arith.constant dense<0.000000e+00> : vector<2xf32>
    %26 = vector.multi_reduction <add>, %25, %cst_20 [0] : vector<8x2xf32> to vector<2xf32>
    %27 = vector.shape_cast %26 : vector<2xf32> to vector<1x2xf32>
    %28 = tpu.reciprocal %27 : vector<1x2xf32> -> vector<1x2xf32>
    %29 = vector.broadcast %28 : vector<1x2xf32> to vector<8x2xf32>
    %30 = arith.mulf %25, %29 : vector<8x2xf32>
    %c0_21 = arith.constant 0 : index
    %c0_22 = arith.constant 0 : index
    %c0_23 = arith.constant 0 : index
    %31 = vector.load %arg9[%c0_21, %c0_22, %c0_23] : memref<1x2x128xf32, #tpu.memory_space<vmem>>, vector<1x2x128xf32>
    %32 = vector.shape_cast %31 : vector<1x2x128xf32> to vector<2x128xf32>
    %cst_24 = arith.constant dense<0.000000e+00> : vector<8x128xf32>
    %33 = tpu.matmul %30, %32, %cst_24 {dimension_numbers = #tpu.dot_dimension_numbers<[1], [0], [0], [1], [0, 0, 1, 1], [], []>} : vector<8x2xf32>, vector<2x128xf32>, vector<8x128xf32> -> vector<8x128xf32>
    %34 = arith.mulf %13, %33 : vector<8x128xf32>
    %cst_25 = arith.constant dense<0.000000e+00> : vector<128xf32>
    %35 = vector.multi_reduction <add>, %34, %cst_25 [0] : vector<8x128xf32> to vector<128xf32>
    %36 = vector.shape_cast %35 : vector<128xf32> to vector<1x128xf32>
    %37 = vector.broadcast %36 : vector<1x128xf32> to vector<8x128xf32>
    %38 = arith.addf %1, %37 : vector<8x128xf32>
    %c0_26 = arith.constant 0 : index
    %c0_27 = arith.constant 0 : index
    %c0_28 = arith.constant 0 : index
    %39 = vector.load %arg10[%c0_26, %c0_27, %c0_28] : memref<1x8x128xf32, #tpu.memory_space<vmem>>, vector<1x8x128xf32>
    %40 = vector.shape_cast %39 : vector<1x8x128xf32> to vector<8x128xf32>
    %41 = vector.shape_cast %38 : vector<8x128xf32> to vector<1x8x128xf32>
    tpu.vector_store %arg10[%c0_26, %c0_27, %c0_28], %41 {strides = array<i32>} : memref<1x8x128xf32, #tpu.memory_space<vmem>>, vector<1x8x128xf32>,
    return
  }
  func.func @transform_0(%arg0: i32, %arg1: i32) -> (i32, i32, i32) {
    %c0_i32 = arith.constant 0 : i32
    %c0_i32_0 = arith.constant 0 : i32
    return %arg0, %c0_i32, %arg1 : i32, i32, i32
  }
  func.func @transform_1(%arg0: i32, %arg1: i32) -> (i32, i32) {
    %c0_i32 = arith.constant 0 : i32
    %c0_i32_0 = arith.constant 0 : i32
    %c0_i32_1 = arith.constant 0 : i32
    return %c0_i32, %c0_i32_0 : i32, i32
  }
  func.func @transform_2(%arg0: i32, %arg1: i32) -> (i32, i32) {
    %c0_i32 = arith.constant 0 : i32
    %c0_i32_0 = arith.constant 0 : i32
    %c0_i32_1 = arith.constant 0 : i32
    return %c0_i32, %c0_i32_0 : i32, i32
  }
  func.func @transform_3(%arg0: i32, %arg1: i32) -> (i32, i32) {
    %c0_i32 = arith.constant 0 : i32
    %c0_i32_0 = arith.constant 0 : i32
    %c0_i32_1 = arith.constant 0 : i32
    return %c0_i32, %c0_i32_0 : i32, i32
  }
  func.func @transform_4(%arg0: i32, %arg1: i32) -> (i32, i32) {
    %c0_i32 = arith.constant 0 : i32
    %c0_i32_0 = arith.constant 0 : i32
    %c0_i32_1 = arith.constant 0 : i32
    return %c0_i32, %c0_i32_0 : i32, i32
  }
  func.func @transform_5(%arg0: i32, %arg1: i32) -> (i32, i32, i32) {
    %c0_i32 = arith.constant 0 : i32
    %c0_i32_0 = arith.constant 0 : i32
    %c0_i32_1 = arith.constant 0 : i32
    return %arg1, %c0_i32, %c0_i32_0 : i32, i32, i32
  }
  func.func @transform_6(%arg0: i32, %arg1: i32) -> (i32, i32, i32) {
    %c0_i32 = arith.constant 0 : i32
    %c0_i32_0 = arith.constant 0 : i32
    %c0_i32_1 = arith.constant 0 : i32
    return %arg1, %c0_i32, %c0_i32_0 : i32, i32, i32
  }
  func.func @transform_7(%arg0: i32, %arg1: i32) -> (i32, i32, i32) {
    %c0_i32 = arith.constant 0 : i32
    %c0_i32_0 = arith.constant 0 : i32
    %c0_i32_1 = arith.constant 0 : i32
    return %arg1, %c0_i32, %c0_i32_0 : i32, i32, i32
  }
  func.func @transform_8(%arg0: i32, %arg1: i32) -> (i32, i32, i32) {
    %c0_i32 = arith.constant 0 : i32
    %c0_i32_0 = arith.constant 0 : i32
    return %arg0, %c0_i32, %arg1 : i32, i32, i32
  }
}

</mosaic_0001>

<bundles_post_ra>
// kernel: tpu_custom_call.1
= control target key start
LH: loop header
LB: loop body
LE: loop exit
PB: predicated region body
PF: predicated region fallthrough
CT: control target
= control target key end

     0   :  { %s1396_s0 = inlined_call_operand.vmem [shape: f32[2,8,256], index: 0, kind: input, shape index: {}]   ;;  %s1397_s1 = inlined_call_operand.vmem [shape: f32[4,8], index: 1, kind: input, shape index: {}]   ;;  %s1398_s2 = inlined_call_operand.vmem [shape: f32[4,1], index: 2, kind: input, shape index: {}]   ;;  %s1399_s3 = inlined_call_operand.vmem [shape: f32[8,4], index: 3, kind: input, shape index: {}]   ;;  %s1400_s4 = inlined_call_operand.vmem [shape: f32[8,1], index: 4, kind: input, shape index: {}]   ;;  %s1401_s5 = inlined_call_operand.vmem [shape: f32[2,128,2], index: 5, kind: input, shape index: {}]   ;;  %s1402_s6 = inlined_call_operand.vmem [shape: f32[2,1,2], index: 6, kind: input, shape index: {}]   ;;  %s1403_s7 = inlined_call_operand.vmem [shape: f32[2,2,128], index: 7, kind: input, shape index: {}]   ;;  %s1404_s8 = inlined_call_operand.hbm [shape: f32[2,8,256], index: 8, kind: output, shape index: {}]  }
   0x1   :  { %1407 = sst [smem:[#allocation7_spill]] %s1398_s2 }
   0x2   :  { %13 = vsyncpa [#allocation3], 0 }
   0x3   :  { %15 = vsyncpa [#allocation3 + $0x1], 0  ;;  %s1193_s27 = smov 0   ;;  %s1195_s28 = smov 0  }
   0x4   :  { %s1197_s29 = smov 0   ;;  %s1199_s30 = smov 0  }
   0x5   :  { %s1201_s9 = smov 0   ;;  %s1203_s10 = smov 0  }
   0x6   :  { %s1205_s11 = smov 0   ;;  %s1207_s12 = smov 0  }
   0x7 LB: > { %s875_s13 = sadd.s32 4294967295, %s1142_s12   ;;  %s876_s14 = sadd.s32 4294967294, %s1142_s12   ;;  %s1142_s12 = sphi %s1207_s12, %s21_s12   ;;  %s1138_s11 = sphi %s1205_s11, %s1421_s11   ;;  %s1134_s10 = sphi %s1203_s10, %s1420_s10   ;;  %s1130_s9 = sphi %s1201_s9, %s1419_s9   ;;  %s1126_s30 = sphi %s1199_s30, %s1418_s30   ;;  %s1122_s29 = sphi %s1197_s29, %s1417_s29   ;;  %s1118_s28 = sphi %s1195_s28, %s1416_s28   ;;  %s1114_s27 = sphi %s1193_s27, %s1415_s27  }
   0x8   : > { %s30_s15 = sadd.s32 1, %s1134_s10  ;;  %s33_s16 = sadd.s32 1, %s1138_s11 }
   0x9   : > { %p31_p0 = scmp.ge.s32.totalorder %s30_s15, 2  ;;  %p242_p1 = scmp.ne.s32.totalorder %s1122_s29, %s1118_s28 }
   0xa   : > { %p243_p2 = scmp.eq.s32.totalorder %s875_s13, 3  ;;  %p248_p5 = scmp.ne.s32.totalorder %s1118_s28, %s1114_s27 }
   0xb   : > { %s1423_s15 = smov (%p31_p0, %s30_s15), 0  ;;  %s1425_s16 = smov (!%p31_p0, %s33_s16), %s1138_s11 }
   0xc   : > { %1408 = sst [smem:[#allocation5_spill]] %s1423_s15  ;;  %s228_s17 = ssub.s32 %s1134_s10, %s1423_s15 }
   0xd   : > { %p1244_p3 = por %p243_p2, %p242_p1  ;;  %p35_p4 = scmp.ge.s32.totalorder %s1425_s16, 2 }
   0xe   : > { %p249_p6 = scmp.eq.s32.totalorder %s876_s14, 3  ;;  %p879_p7 = scmp.ge.s32.totalorder %s1142_s12, 1 }
   0xf   : > { %s1427_s16 = smov (%p35_p4, %s1425_s16), 0  ;;  %p311_p9 = scmp.lt.s32.totalorder %s1142_s12, 5 }
  0x10   : > { %1410 = sst [smem:[#allocation6_spill]] %s1427_s16  ;;  %p1253_p8 = por %p249_p6, %p248_p5 }
  0x11   : > { %s227_s20 = ssub.s32 %s1138_s11, %s1427_s16  ;;  %s232_s21 = sadd.s32 1, %s1122_s29 }
  0x12   : > { %s229_s22 = sor.u32 %s228_s17, %s227_s20  ;;  %p312_p10 = pnand %p879_p7, %p311_p9 }
  0x13   : > { %p230_p11 = scmp.eq.s32.totalorder %s229_s22, 0  ;;  %p360_p12 = scmp.lt.s32.totalorder (!%p312_p10), %s1130_s9, 1 }
  0x14   : > { %315 = sbr.rel (%p312_p10) target bundleno = 903 (0x387), region = 52  ;;  %p362_p13 = scmp.lt.s32.totalorder (!%p312_p10), %s1126_s30, 1 }
  0x15   : > { %s1262_s23 = scalar_select %p230_p11, %s1122_s29, %s232_s21  }
  0x16   : > { %s1412_s2 = sld [smem:[#allocation7_spill]] (!%p312_p10) }
  0x19   : > { %v1144_v0 = vmov 0.0   ;;  %vm1145_vm0 = vmmov 0   ;;  %s361_s26 = scalar_select %p360_p12, %s1130_s9, 1  ;;  %v1146_v2 = vmov 0   ;;  %v464_v3 = vld [vmem:[%s1400_s4] sm:$0xff]  ;;  %vm388_vm1 = vcmask 64512  }
  0x1a   : > { %921 = vmatprep.subr.mxu1 %v1144_v0  ;;  %923 = vmatprep.mubr.msk.f32.mxu1 %vm1145_vm0, %v1144_v0  ;;  %s1275_s13 = scalar_select %p362_p13, %s1126_s30, 1  ;;  %v381_v4 = vld [vmem:[%s1397_s1] sm:$0xf]  ;;  %vm474_vm2 = vcmask 1043456   ;;  %vm470_vm3 = vcmask 31744   ;;  %vm665_vm4 = vcmask 1041408  }
  0x1b   : > { %1045 = vset.pattern.permute.xlu0 %v1146_v2  ;;  %931 = vmatprep.subr.mxu0 %v1144_v0  ;;  %s881_s14 = sshll.u32 %s361_s26, 1  ;;  %v463_v25 = vld [vmem:[%s1399_s3] sm:$0xff]  ;;  %vm641_vm5 = vcmask 15360  }
  0x1c   : > { %v382_v1 = vld [vmem:[%s1412_s2] sm:$0xf]  ;;  %963 = vmatprep.mubr.msk.f32.mxu0 %vm1145_vm0, %v1144_v0  ;;  %s365_s21 = sadd.s32 %s881_s14, %s1275_s13  ;;  %s897_s26 = sshll.u32 %s1275_s13, 7 }
  0x1d   : > { %385 = vperm.xlu0 %1045, %v382_v1   ;;  %s882_s22 = sshll.u32 %s365_s21, 3  ;;  %s1299_s20 = scalar_lea.vmem %s1401_s5, %s897_s26 }
  0x1e   : > { %s367_s2 = scalar_lea.vmem %s1396_s0, %s882_s22  ;;  %v563_v6 = vld [vmem:[%s1299_s20 + $0x78] sm:$0xff]  ;;  %v562_v7 = vld [vmem:[%s1299_s20 + $0x70] sm:$0xff]  ;;  %v561_v8 = vld [vmem:[%s1299_s20 + $0x68] sm:$0xff]  ;;  %s885_s16 = sshll.u32 %s1275_s13, 1 }
  0x1f   : > { %v1289_v5 = vld [vmem:[%s367_s2] sm:$0xff]  ;;  %932 = vmatpush3.msra.mxu0 %v563_v6  ;;  %v559_v10 = vld [vmem:[%s1299_s20 + $0x58] sm:$0xff]  ;;  %v558_v11 = vld [vmem:[%s1299_s20 + $0x50] sm:$0xff]  ;;  %s379_s24 = scalar_lea.vmem %s1403_s7, %s885_s16  ;;  %s375_s14 = scalar_lea.vmem %s1402_s6, %s1275_s13 }
  0x20   : > { %922 = vmatpush3.msra.mxu1 %v1289_v5  ;;  %933 = vmatprep.subr.mxu0 %v1144_v0  ;;  %v560_v9 = vld [vmem:[%s1299_s20 + $0x60] sm:$0xff]  ;;  %v557_v12 = vld [vmem:[%s1299_s20 + $0x48] sm:$0xff]  ;;  %v555_v14 = vld [vmem:[%s1299_s20 + $0x38] sm:$0xff]  ;;  %s357_s13 = sand.u32 1, %s1118_s28  }
  0x21   : > { %467 = vperm.xlu0 %1045, %v464_v3   ;;  %924 = vmatmul.mubr.msk.f32.vlgmr.msra.gmra.mxu1 %vm388_vm1, %v381_v4  ;;  %v556_v13 = vld [vmem:[%s1299_s20 + $0x40] sm:$0xff]  ;;  %v554_v15 = vld [vmem:[%s1299_s20 + $0x30] sm:$0xff]  ;;  %v553_v16 = vld [vmem:[%s1299_s20 + $0x28] sm:$0xff]  ;;  %s880_s17 = sshll.u32 %s357_s13, 3  ;;  %s749_s26 = scalar_lea.sflag [#allocation3], %s357_s13 }
  0x22   : > { %926 = vmatprep.subr.mxu1 %v1144_v0  ;;  %928 = vmatprep.mubr.msk.f32.mxu1 %vm1145_vm0, %v1144_v0  ;;  %v552_v17 = vld [vmem:[%s1299_s20 + $0x20] sm:$0xff]  ;;  %v551_v18 = vld [vmem:[%s1299_s20 + $0x18] sm:$0xff]  ;;  %v550_v19 = vld [vmem:[%s1299_s20 + $0x10] sm:$0xff]  ;;  %s359_s16 = scalar_lea.vmem [#allocation2], %s880_s17 }
  0x23   : > { %934 = vmatpush3.msra.mxu0 %v562_v7  ;;  %v549_v26 = vld [vmem:[%s1299_s20 + $0x8] sm:$0xff]  ;;  %v548_v27 = vld [vmem:[%s1299_s20] sm:$0xff]  ;;  %s893_s20 = sshll.u32 %s1130_s9, 1  ;;  %s764_s21 = sshll.u32 %s359_s16, 4  ;;  %s765_s21 = int_to_ptr.vmem [resolvable:$true] %s764_s21 }
  0x24   : > { %935 = vmatprep.subr.mxu0 %v1144_v0  ;;  %v661_v32 = vld [vmem:[%s379_s24] sm:$0x3]  ;;  %s760_s2 = sadd.s32 %s1126_s30, %s893_s20  ;;  %s1147_s30 = smov [#allocation2]  }
  0x25   : > { %936 = vmatpush3.msra.mxu0 %v561_v8  ;;  %v889_v33 = vld [vmem:[%s375_s14] ss:$0 sm:$0xff]  ;;  %s894_s15 = sshll.u32 %s760_s2, 7  ;;  %s1050_s14 = scalar_lea.vmem %s765_s21, 128 }
  0x26   : > { %937 = vmatprep.subr.mxu0 %v1144_v0  ;;  %s762_s25 = scalar_lea.hbm %s1404_s8, %s894_s15  ;;  %p1051_p0 = scmp.ne.s32.totalorder %s765_s21, %s1050_s14 }
  0x27   : > { %938 = vmatpush3.msra.mxu0 %v560_v9  ;;  %s1054_s9 = sshll.u32 %s1147_s30, 4  ;;  %s1055_s9 = int_to_ptr.vmem [resolvable:$false] %s1054_s9 }
  0x28   : > { %939 = vmatprep.subr.mxu0 %v1144_v0  ;;  %p1052_p1 = pnand %p1051_p0, %p1244_p3  ;;  %s1056_s17 = scalar_lea.vmem %s1055_s9, 256 }
  0x29   : > { %940 = vmatpush3.msra.mxu0 %v559_v10  ;;  %p1057_p4 = scmp.lt.s32.totalorder %s765_s21, %s1055_s9  ;;  %p1058_p5 = scmp.lt.s32.totalorder %s1056_s17, %s1050_s14 }
  0x2a   : > { %941 = vmatprep.subr.mxu0 %v1144_v0  ;;  %p1053_p2 = pneg %p1052_p1 }
  0x2b   : > { %942 = vmatpush3.msra.mxu0 %v558_v11  ;;  %p1059_p6 = por %p1058_p5, %p1057_p4 }
  0x2c   : > { %943 = vmatprep.subr.mxu0 %v1144_v0 }
  0x2d   : > { %944 = vmatpush3.msra.mxu0 %v557_v12  ;;  %p1060_p7 = pnand %p1059_p6, %p1053_p2 }
  0x2e   : > { %945 = vmatprep.subr.mxu0 %v1144_v0 }
  0x2f   : > { %946 = vmatpush3.msra.mxu0 %v556_v13 }
  0x30   : > { %947 = vmatprep.subr.mxu0 %v1144_v0 }
  0x31   : > { %948 = vmatpush3.msra.mxu0 %v555_v14 }
  0x32   : > { %949 = vmatprep.subr.mxu0 %v1144_v0 }
  0x33   : > { %950 = vmatpush3.msra.mxu0 %v554_v15 }
  0x34   : > { %951 = vmatprep.subr.mxu0 %v1144_v0 }
  0x35   : > { %952 = vmatpush3.msra.mxu0 %v553_v16 }
  0x36   : > { %953 = vmatprep.subr.mxu0 %v1144_v0 }
  0x37   : > { %954 = vmatpush3.msra.mxu0 %v552_v17 }
  0x38   : > { %955 = vmatprep.subr.mxu0 %v1144_v0 }
  0x39   : > { %956 = vmatpush3.msra.mxu0 %v551_v18 }
  0x3a   : > { %957 = vmatprep.subr.mxu0 %v1144_v0 }
  0x3b   : > { %958 = vmatpush3.msra.mxu0 %v550_v19 }
  0x3c   : > { %959 = vmatprep.subr.mxu0 %v1144_v0 }
  0x3d   : > { %960 = vmatpush3.msra.mxu0 %v549_v26 }
  0x3e   : > { %961 = vmatprep.subr.mxu0 %v1144_v0 }
  0x3f   : > { %962 = vmatpush3.msra.mxu0 %v548_v27 }
  0x98   : > { %v386_v20 = vpop.permute.xlu0 %385 }
  0x9c   : > { %v468_v28 = vpop.permute.xlu0 %467 }
  0xe1   : > { %v458_v21 = vpop.f32.mrf.mxu1 }
  0xe2   : > { %v459_v22 = vadd.f32 %v458_v21, %v386_v20 }
  0xe3   : > { %v925_v23 = vpop.f32.mrf.mxu1 }
  0xe4   : > { %v462_v24 = vmax.f32 %v459_v22, 0.0 }
  0xe6   : > { %927 = vmatpush3.msk.msra.mxu1 %vm474_vm2, %v462_v24 }
  0xe7   : > { %929 = vmatmul.mubr.msk.f32.vlgmr.msra.gmra.mxu1 %vm470_vm3, %v463_v25  ;;  %966 = vmatprep.subr.mxu1 %v1144_v0 }
  0xe8   : > { %968 = vmatprep.mubr.msk.f32.mxu1 %vm1145_vm0, %v1144_v0  ;;  %967 = vmatpush3.msk.msra.mxu1 %vm665_vm4, %v661_v32 }
 0x1a7   : > { %v544_v29 = vpop.f32.mrf.mxu1 }
 0x1a8   : > { %v545_v30 = vadd.f32 %v544_v29, %v468_v28 }
 0x1a9   : > { %v930_v31 = vpop.f32.mrf.mxu1 }
 0x1aa   : > { %964 = vmatmul.mubr.f32.vlgmr.msra.gmra.mxu0 %v545_v30 }
 0x26a   : > { %v637_v34 = vpop.f32.mrf.mxu0 }
 0x26b   : > { %v638_v35 = vadd.f32 %v889_v33, %v637_v34 }
 0x26c   : > { %v965_v36 = vpop.f32.mrf.mxu0 }
 0x26d   : > { %v642_v37 = vsel %vm641_vm5, %v638_v35, -inf }
 0x26e   : > { %v643_v38 = vrot.slane %v642_v37, 4 }
 0x270   : > { %v644_v39 = vmax.f32 %v642_v37, %v643_v38 }
 0x272   : > { %v645_v40 = vrot.slane %v644_v39, 2 }
 0x274   : > { %v646_v41 = vmax.f32 %v644_v39, %v645_v40 }
 0x276   : > { %v647_v42 = vrot.slane %v646_v41, 1 }
 0x278   : > { %v648_v43 = vmax.f32 %v646_v41, %v647_v42 }
 0x27a   : > { %v649_v44 = vsub.f32 %v638_v35, %v648_v43 }
 0x27c   : > { %v650_v45 = vmul.f32 1.442695, %v649_v44 }
 0x27e   : > { %1046 = vpow2.f32 %v650_v45 }
 0x28b   : > { %v1047_v46 = vpop.eup %1046 }
 0x28c   : > { %v652_v47 = vsel %vm641_vm5, %v1047_v46, 0.0 }
 0x28d   : > { %v653_v48 = vrot.slane %v652_v47, 4 }
 0x28f   : > { %v654_v49 = vadd.f32 %v653_v48, %v652_v47 }
 0x291   : > { %v655_v50 = vrot.slane %v654_v49, 2 }
 0x293   : > { %v656_v51 = vadd.f32 %v655_v50, %v654_v49 }
 0x295   : > { %v657_v52 = vrot.slane %v656_v51, 1 }
 0x297   : > { %v658_v53 = vadd.f32 %v657_v52, %v656_v51 }
 0x299   : > { %1048 = vrcp.f32 %v658_v53 }
 0x2a6   : > { %v1049_v54 = vpop.eup %1048 }
 0x2a7   : > { %v660_v55 = vmul.f32 %v1049_v54, %v1047_v46 }
 0x2a9   : > { %969 = vmatmul.mubr.msk.f32.vlgmr.msra.gmra.mxu1 %vm641_vm5, %v660_v55 }
 0x369   : > { %v735_v56 = vpop.f32.mrf.mxu1 }
 0x36a   : > { %v739_v57 = vmul.f32 %v735_v56, %v545_v30 }
 0x36b   : > { %v970_v58 = vpop.f32.mrf.mxu1 }
 0x36c   : > { %v740_v59 = vrot.slane %v739_v57, 4 }
 0x36e   : > { %v741_v60 = vadd.f32 %v740_v59, %v739_v57 }
 0x370   : > { %v742_v61 = vrot.slane %v741_v60, 2 }
 0x372   : > { %v743_v62 = vadd.f32 %v742_v61, %v741_v60 }
 0x374   : > { %v744_v63 = vrot.slane %v743_v62, 1 }
 0x376   : > { %v745_v0 = vadd.f32 %v744_v63, %v743_v62 }
 0x378   : > { %v746_v1 = vadd.f32 %v745_v0, %v1289_v5 }
 0x37a   : > { %747 = vst [vmem:[%s359_s16] sm:$0xff] %v746_v1 }
 0x37b   : > { %1063 = shalt.err (!%p1060_p7)
}
 0x37c   : > { %s1064_s20 = scalar_lea.hbm %s762_s25, 128  ;;  %s1068_s15 = scalar_lea.hbm %s1404_s8, 512 }
 0x37d   : > { %p1065_p9 = scmp.ne.s32.totalorder %s762_s25, %s1064_s20  ;;  %p1069_p12 = scmp.lt.s32.totalorder %s762_s25, %s1404_s8 }
 0x37e   : > { %p1070_p13 = scmp.lt.s32.totalorder %s1068_s15, %s1064_s20 }
 0x37f   : > { %p1066_p10 = pnand %p1065_p9, %p1244_p3 }
 0x380   : > { %p1071_p0 = por %p1070_p13, %p1069_p12 }
 0x381   : > { %p1067_p11 = pneg %p1066_p10 }
 0x383   : > { %p1072_p1 = pnand %p1071_p0, %p1067_p11 }
 0x385   : > { %1075 = shalt.err (!%p1072_p1)
}
 0x386   : > { %971 = dma.vmem_to_hbm [thread:$0]  (%p1244_p3), %s765_s21, 128, %s762_s25, %s749_s26  }
 0x387 PF: > { %p977_p2 = scmp.ge.s32.totalorder %s1142_s12, 2  ;;  %s776_s24 = sand.u32 1, %s1114_s27  }
 0x388   : > { %s777_s14 = scalar_lea.sflag [#allocation3], %s776_s24 }
 0x389   : > { %p974_p4 = pnand %p977_p2, %p1253_p8 }
 0x38b   : > { %p975_p5 = pneg %p974_p4 }
 0x38d   : > { %1109 = dma.done.wait (%p975_p5), %s777_s14, 128  }
 0x38e   : > { %1111 = vsyncadd (%p975_p5), %s777_s14, 4294967168  ;;  %s21_s12 = sadd.s32 1, %s1142_s12   ;;  %s1413_s18 = sld [smem:[#allocation5_spill]] }
 0x38f   : > { %p18_p6 = scmp.ge.s32.totalorder %s21_s12, 6   ;;  %s1414_s21 = sld [smem:[#allocation6_spill]] }
 0x390   : > { %s1415_s27 = smov %s1118_s28  ;;  %s1416_s28 = smov %s1122_s29 }
 0x391   : > { %s1417_s29 = smov %s1262_s23  ;;  %s1418_s30 = smov %s1134_s10 }
 0x392   : > { %s1419_s9 = smov %s1138_s11  ;;  %20 = sbr.rel (!%p18_p6) target bundleno = 7 (0x7), region = 96 }
 0x394   : > { %s1420_s10 = smov %s1413_s18 }
 0x395   : > { %s1421_s11 = smov %s1414_s21 }
 0x397   :  { %782 = vsyncpa [#allocation3], 1 }
 0x398   :  { %784 = vsyncpa [#allocation3 + $0x1], 1 }

</bundles_post_ra>
